<compile_context>
chip_gen: v5e
topology: v5e:2x2
jax: 0.10.0
libtpu: 0.0.40
codegen_flags: <defaults>
</compile_context>

<pallas_src>
import functools

import jax
import jax.numpy as jnp
from jax.experimental import pallas as pl
from jax.experimental.pallas import tpu as pltpu


# ---------------------------------------------------------------------------
# Activations (only ops with guaranteed Mosaic lowerings: mul/add/abs/where/
# exp/tanh; the transcendental goes to the EUP slot).
# ---------------------------------------------------------------------------

def _erf(z):
    # Abramowitz & Stegun 7.1.26 rational approximation, |error| <= 1.5e-7.
    a1, a2, a3, a4, a5 = (0.254829592, -0.284496736, 1.421413741,
                          -1.453152027, 1.061405429)
    p = 0.3275911
    az = jnp.abs(z)
    t = 1.0 / (1.0 + p * az)
    poly = ((((a5 * t + a4) * t + a3) * t + a2) * t + a1) * t
    e = 1.0 - poly * jnp.exp(-az * az)
    return jnp.where(z < 0.0, -e, e)


def _gelu_exact(x):
    # erf-based GELU: matches torch.nn.functional.gelu default to ~1e-7.
    return 0.5 * x * (1.0 + _erf(x * 0.7071067811865476))


def _gelu_tanh(x):
    # tanh-approximate GELU (EUP tanh, much cheaper on the VALU slot).
    c = 0.7978845608028654  # sqrt(2/pi)
    return 0.5 * x * (1.0 + jnp.tanh(c * (x + 0.044715 * x * x * x)))


# ---------------------------------------------------------------------------
# Kernel: one channels-first pixel tile, chunked along lanes.
# ---------------------------------------------------------------------------

def _mlp_kernel(x_ref, w1t_ref, b1_ref, w2t_ref, b2_ref, o_ref, *,
                chunk, n_chunks, approximate_gelu):
    # x_ref:   (Rin,  TM)  channels-first pixel tile (Rin = packed batch*Cin)
    # w1t_ref: (Rhid, Rin)   b1_ref: (Rhid, 1)
    # w2t_ref: (Rout, Rhid)  b2_ref: (Rout, 1)
    # o_ref:   (Rout, TM)
    w1t = w1t_ref[...]
    w2t = w2t_ref[...]
    # Hoist bias broadcasts out of the chunk loop (no CSE of broadcast_in_dim).
    b1 = jnp.broadcast_to(b1_ref[...], (w1t.shape[0], chunk))
    b2 = jnp.broadcast_to(b2_ref[...], (w2t.shape[0], chunk))
    act = _gelu_tanh if approximate_gelu else _gelu_exact

    def body(c, carry):
        start = pl.multiple_of(c * chunk, 128)
        x = x_ref[:, pl.ds(start, chunk)].astype(jnp.float32)
        h = jnp.dot(w1t, x, preferred_element_type=jnp.float32) + b1
        h = act(h)
        y = jnp.dot(w2t, h, preferred_element_type=jnp.float32) + b2
        o_ref[:, pl.ds(start, chunk)] = y.astype(o_ref.dtype)
        return carry

    jax.lax.fori_loop(0, n_chunks, body, 0, unroll=(n_chunks <= 8))


# ---------------------------------------------------------------------------
# Tiling helpers.
# ---------------------------------------------------------------------------

def _pick_tm(hw_pad, cap):
    """Largest multiple of 128 <= cap that divides hw_pad (hw_pad % 128 == 0)."""
    t = max(128, (min(cap, hw_pad) // 128) * 128)
    while hw_pad % t != 0:
        t -= 128
    return t


def _pick_chunk(tm, hidden_rows):
    """Lane chunk for in-kernel compute: keep the (hidden_rows, chunk) f32
    activation around <=64 KiB so it stays in the vreg file, not VMEM."""
    target = max(128, (64 * 1024) // max(1, hidden_rows * 4))
    target = max(128, min(tm, 1024, (target // 128) * 128))
    c = target
    while tm % c != 0:
        c -= 128
    return max(c, 128)


# ---------------------------------------------------------------------------
# Wrapper.
# ---------------------------------------------------------------------------

def mlp_base_pallas(x_nchw, w1, b1, w2, b2, *, tile_m=16384,
                    approximate_gelu=False):
    """x_nchw: (B, Cin, H, W); w1: (Cin, Hid); b1: (Hid,); w2: (Hid, Cout); b2: (Cout,)."""
    B, Cin, H, W = x_nchw.shape
    Hid = w1.shape[1]
    Cout = w2.shape[1]
    HW = H * W
    hw_pad = ((HW + 127) // 128) * 128
    dtype = x_nchw.dtype

    # Batch packing factor G: fold G batches into one sublane-dense row block
    # (G*Cin and G*Cout multiples of 8).  Falls back to the generic path.
    G = 0
    for g in range(1, 9):
        if B % g == 0 and (g * Cin) % 8 == 0 and (g * Cout) % 8 == 0:
            G = g
            break

    n_row_blocks = B // G if G else B
    tm = _pick_tm(hw_pad, min(tile_m, hw_pad))
    # v7x has 2 TensorCores: make sure the parallel grid has >= 2 steps.
    if n_row_blocks * (hw_pad // tm) < 2 and hw_pad >= 256:
        tm = _pick_tm(hw_pad, max(128, hw_pad // 2))
    n_tiles = hw_pad // tm
    grid = (n_row_blocks, n_tiles)

    hidden_rows = (G if G else 1) * Hid
    chunk = _pick_chunk(tm, hidden_rows)
    kernel = functools.partial(_mlp_kernel, chunk=chunk, n_chunks=tm // chunk,
                               approximate_gelu=approximate_gelu)

    flops = 2 * B * HW * (Cin * Hid + Hid * Cout)
    bytes_accessed = (dtype.itemsize * B * HW * (Cin + Cout)
                      + 4 * (Cin * Hid + Hid + Hid * Cout + Cout))
    cost = pl.CostEstimate(flops=flops, transcendentals=B * HW * Hid,
                           bytes_accessed=bytes_accessed)
    cparams = pltpu.CompilerParams(
        dimension_semantics=("parallel", "parallel"),
        vmem_limit_bytes=32 * 1024 * 1024,
    )

    w1t = jnp.transpose(w1).astype(jnp.float32)   # (Hid, Cin)
    w2t = jnp.transpose(w2).astype(jnp.float32)   # (Cout, Hid)
    b1f = b1.astype(jnp.float32)
    b2f = b2.astype(jnp.float32)

    if G:
        # Sublane-dense path: x viewed as (B*Cin, HW); block-diagonal weights
        # run G batches per MXU matmul (the extra zero MACs ride on MXU slack).
        x2d = x_nchw.reshape(B * Cin, HW)
        if hw_pad != HW:
            x2d = jnp.pad(x2d, ((0, 0), (0, hw_pad - HW)))
        eye = jnp.eye(G, dtype=jnp.float32)
        w1bd = jnp.kron(eye, w1t)                       # (G*Hid, G*Cin)
        w2bd = jnp.kron(eye, w2t)                       # (G*Cout, G*Hid)
        b1bd = jnp.tile(b1f, G).reshape(G * Hid, 1)
        b2bd = jnp.tile(b2f, G).reshape(G * Cout, 1)

        out2d = pl.pallas_call(
            kernel,
            out_shape=jax.ShapeDtypeStruct((B * Cout, hw_pad), dtype),
            grid_spec=pltpu.PrefetchScalarGridSpec(
                num_scalar_prefetch=0,
                grid=grid,
                in_specs=[
                    pl.BlockSpec((G * Cin, tm), lambda r, i: (r, i)),
                    pl.BlockSpec((G * Hid, G * Cin), lambda r, i: (0, 0)),
                    pl.BlockSpec((G * Hid, 1), lambda r, i: (0, 0)),
                    pl.BlockSpec((G * Cout, G * Hid), lambda r, i: (0, 0)),
                    pl.BlockSpec((G * Cout, 1), lambda r, i: (0, 0)),
                ],
                out_specs=pl.BlockSpec((G * Cout, tm), lambda r, i: (r, i)),
            ),
            compiler_params=cparams,
            cost_estimate=cost,
        )(x2d, w1bd, b1bd, w2bd, b2bd)
        return out2d[:, :HW].reshape(B, Cout, H, W)

    # Generic fallback (batch/channels that don't pack into 8 sublanes).
    x3d = x_nchw.reshape(B, Cin, HW)
    if hw_pad != HW:
        x3d = jnp.pad(x3d, ((0, 0), (0, 0), (0, hw_pad - HW)))
    out3d = pl.pallas_call(
        kernel,
        out_shape=jax.ShapeDtypeStruct((B, Cout, hw_pad), dtype),
        grid_spec=pltpu.PrefetchScalarGridSpec(
            num_scalar_prefetch=0,
            grid=grid,
            in_specs=[
                pl.BlockSpec((None, Cin, tm), lambda b, i: (b, 0, i)),
                pl.BlockSpec((Hid, Cin), lambda b, i: (0, 0)),
                pl.BlockSpec((Hid, 1), lambda b, i: (0, 0)),
                pl.BlockSpec((Cout, Hid), lambda b, i: (0, 0)),
                pl.BlockSpec((Cout, 1), lambda b, i: (0, 0)),
            ],
            out_specs=pl.BlockSpec((None, Cout, tm), lambda b, i: (b, 0, i)),
        ),
        compiler_params=cparams,
        cost_estimate=cost,
    )(x3d, w1t, b1f.reshape(Hid, 1), w2t, b2f.reshape(Cout, 1))
    return out3d[:, :, :HW].reshape(B, Cout, H, W)


# ---------------------------------------------------------------------------
# Pure-JAX reference (matches the torch module's forward).
# ---------------------------------------------------------------------------

def _reference(x_nchw, w1, b1, w2, b2, *, approximate=False):
    xf = x_nchw.astype(jnp.float32)
    h = jnp.einsum("bchw,cd->bdhw", xf, w1) + b1[None, :, None, None]
    h = jax.nn.gelu(h, approximate=approximate)
    y = jnp.einsum("bchw,cd->bdhw", h, w2) + b2[None, :, None, None]
    return y.astype(x_nchw.dtype)


if __name__ == "__main__":
    B, Cin, H, W = 2, 4, 16, 16
    Hid, Cout = 32, 4

    key = jax.random.PRNGKey(0)
    k_x, k_w1, k_b1, k_w2, k_b2 = jax.random.split(key, 5)

    x = jax.random.normal(k_x, (B, Cin, H, W), dtype=jnp.float32)
    # Conv2d(kernel_size=1) weights flattened to (in, out) linear form.
    w1 = jax.random.normal(k_w1, (Cin, Hid), dtype=jnp.float32) * (1.0 / Cin) ** 0.5
    b1 = jax.random.normal(k_b1, (Hid,), dtype=jnp.float32) * 0.01
    w2 = jax.random.normal(k_w2, (Hid, Cout), dtype=jnp.float32) * (1.0 / Hid) ** 0.5
    b2 = jax.random.normal(k_b2, (Cout,), dtype=jnp.float32) * 0.01

    # Default: exact (erf) GELU, matching torch F.gelu semantics.
    out = jax.block_until_ready(mlp_base_pallas(x, w1, b1, w2, b2))
    ref = _reference(x, w1, b1, w2, b2, approximate=False)
    assert out.shape == (B, Cout, H, W)
    assert jnp.allclose(out, ref, atol=1e-4, rtol=1e-4)

    # Generic fallback path (odd batch -> no sublane packing).
    out1 = jax.block_until_ready(mlp_base_pallas(x[:1], w1, b1, w2, b2))
    ref1 = _reference(x[:1], w1, b1, w2, b2, approximate=False)
    assert jnp.allclose(out1, ref1, atol=1e-4, rtol=1e-4)

    # Optional tanh-GELU fast path (needs accuracy sign-off vs erf form).
    out_t = jax.block_until_ready(
        mlp_base_pallas(x, w1, b1, w2, b2, approximate_gelu=True))
    ref_t = _reference(x, w1, b1, w2, b2, approximate=True)
    assert jnp.allclose(out_t, ref_t, atol=1e-4, rtol=1e-4)

    print("KERNEL_OK")
</pallas_src>

<mosaic_0001>
module attributes {stable_mosaic.version = 11 : i64} {
  func.func @_mlp_kernel(%arg0: i32, %arg1: i32, %arg2: memref<8x128xf32, #tpu.memory_space<vmem>>, %arg3: memref<64x8xf32, #tpu.memory_space<vmem>>, %arg4: memref<64x1xf32, #tpu.memory_space<vmem>>, %arg5: memref<8x64xf32, #tpu.memory_space<vmem>>, %arg6: memref<8x1xf32, #tpu.memory_space<vmem>>, %arg7: memref<8x128xf32, #tpu.memory_space<vmem>>) attributes {dimension_semantics = [#tpu.dimension_semantics<parallel>, #tpu.dimension_semantics<parallel>], iteration_bounds = array<i64: 1, 2>, scalar_prefetch = 0 : i64, scratch_operands = 0 : i64, tpu.core_type = #tpu.core_type<tc>, window_params = [{transform_indices = @transform_0, window_bounds = array<i64: 8, 128>}, {pipeline_mode = #tpu.pipeline_mode<synchronous>, transform_indices = @transform_1, window_bounds = array<i64: 64, 8>}, {pipeline_mode = #tpu.pipeline_mode<synchronous>, transform_indices = @transform_2, window_bounds = array<i64: 64, 1>}, {pipeline_mode = #tpu.pipeline_mode<synchronous>, transform_indices = @transform_3, window_bounds = array<i64: 8, 64>}, {pipeline_mode = #tpu.pipeline_mode<synchronous>, transform_indices = @transform_4, window_bounds = array<i64: 8, 1>}, {transform_indices = @transform_5, window_bounds = array<i64: 8, 128>}]} {
    %c0 = arith.constant 0 : index
    %c0_0 = arith.constant 0 : index
    %0 = vector.load %arg3[%c0, %c0_0] : memref<64x8xf32, #tpu.memory_space<vmem>>, vector<64x8xf32>
    %c0_1 = arith.constant 0 : index
    %c0_2 = arith.constant 0 : index
    %1 = vector.load %arg5[%c0_1, %c0_2] : memref<8x64xf32, #tpu.memory_space<vmem>>, vector<8x64xf32>
    %c0_3 = arith.constant 0 : index
    %c0_4 = arith.constant 0 : index
    %2 = vector.load %arg4[%c0_3, %c0_4] : memref<64x1xf32, #tpu.memory_space<vmem>>, vector<64x1xf32>
    %3 = vector.shape_cast %2 : vector<64x1xf32> to vector<64x1xf32>
    %4 = vector.broadcast %3 : vector<64x1xf32> to vector<64x128xf32>
    %c0_5 = arith.constant 0 : index
    %c0_6 = arith.constant 0 : index
    %5 = vector.load %arg6[%c0_5, %c0_6] : memref<8x1xf32, #tpu.memory_space<vmem>>, vector<8x1xf32>
    %6 = vector.shape_cast %5 : vector<8x1xf32> to vector<8x1xf32>
    %7 = vector.broadcast %6 : vector<8x1xf32> to vector<8x128xf32>
    %c0_i32 = arith.constant 0 : i32
    %c128_i32 = arith.constant 128 : i32
    %8 = arith.muli %c0_i32, %c128_i32 : i32
    %9 = tpu.assume_multiple %8, 128 : i32
    %c0_7 = arith.constant 0 : index
    %10 = arith.index_cast %9 : i32 to index
    %11 = vector.load %arg2[%c0_7, %10] : memref<8x128xf32, #tpu.memory_space<vmem>>, vector<8x128xf32>
    %cst = arith.constant dense<0.000000e+00> : vector<64x128xf32>
    %12 = tpu.matmul %0, %11, %cst {dimension_numbers = #tpu.dot_dimension_numbers<[1], [0], [0], [1], [0, 0, 1, 1], [], []>} : vector<64x8xf32>, vector<8x128xf32>, vector<64x128xf32> -> vector<64x128xf32>
    %13 = arith.addf %12, %4 : vector<64x128xf32>
    %cst_8 = arith.constant 5.000000e-01 : f32
    %14 = vector.broadcast %cst_8 : f32 to vector<64x128xf32>
    %15 = arith.mulf %14, %13 : vector<64x128xf32>
    %cst_9 = arith.constant 0.707106769 : f32
    %16 = vector.broadcast %cst_9 : f32 to vector<64x128xf32>
    %17 = arith.mulf %13, %16 : vector<64x128xf32>
    %18 = math.absf %17 : vector<64x128xf32>
    %cst_10 = arith.constant 0.327591091 : f32
    %19 = vector.broadcast %cst_10 : f32 to vector<64x128xf32>
    %20 = arith.mulf %19, %18 : vector<64x128xf32>
    %cst_11 = arith.constant 1.000000e+00 : f32
    %21 = vector.broadcast %cst_11 : f32 to vector<64x128xf32>
    %22 = arith.addf %21, %20 : vector<64x128xf32>
    %cst_12 = arith.constant 1.000000e+00 : f32
    %23 = vector.broadcast %cst_12 : f32 to vector<64x128xf32>
    %24 = arith.divf %23, %22 : vector<64x128xf32>
    %cst_13 = arith.constant 1.06140542 : f32
    %25 = vector.broadcast %cst_13 : f32 to vector<64x128xf32>
    %26 = arith.mulf %25, %24 : vector<64x128xf32>
    %cst_14 = arith.constant -1.45315206 : f32
    %27 = vector.broadcast %cst_14 : f32 to vector<64x128xf32>
    %28 = arith.addf %26, %27 : vector<64x128xf32>
    %29 = arith.mulf %28, %24 : vector<64x128xf32>
    %cst_15 = arith.constant 1.42141378 : f32
    %30 = vector.broadcast %cst_15 : f32 to vector<64x128xf32>
    %31 = arith.addf %29, %30 : vector<64x128xf32>
    %32 = arith.mulf %31, %24 : vector<64x128xf32>
    %cst_16 = arith.constant -0.284496725 : f32
    %33 = vector.broadcast %cst_16 : f32 to vector<64x128xf32>
    %34 = arith.addf %32, %33 : vector<64x128xf32>
    %35 = arith.mulf %34, %24 : vector<64x128xf32>
    %cst_17 = arith.constant 0.254829586 : f32
    %36 = vector.broadcast %cst_17 : f32 to vector<64x128xf32>
    %37 = arith.addf %35, %36 : vector<64x128xf32>
    %38 = arith.mulf %37, %24 : vector<64x128xf32>
    %cst_18 = arith.constant 0.000000e+00 : f32
    %39 = vector.broadcast %cst_18 : f32 to vector<64x128xf32>
    %40 = arith.subf %39, %18 : vector<64x128xf32>
    %41 = arith.mulf %40, %18 : vector<64x128xf32>
    %42 = math.exp %41 : vector<64x128xf32>
    %43 = arith.mulf %38, %42 : vector<64x128xf32>
    %cst_19 = arith.constant 1.000000e+00 : f32
    %44 = vector.broadcast %cst_19 : f32 to vector<64x128xf32>
    %45 = arith.subf %44, %43 : vector<64x128xf32>
    %cst_20 = arith.constant 0.000000e+00 : f32
    %46 = vector.broadcast %cst_20 : f32 to vector<64x128xf32>
    %47 = arith.cmpf olt, %17, %46 : vector<64x128xf32>
    %cst_21 = arith.constant 0.000000e+00 : f32
    %48 = vector.broadcast %cst_21 : f32 to vector<64x128xf32>
    %49 = arith.subf %48, %45 : vector<64x128xf32>
    %50 = arith.select %47, %49, %45 : vector<64x128xi1>, vector<64x128xf32>
    %cst_22 = arith.constant 1.000000e+00 : f32
    %51 = vector.broadcast %cst_22 : f32 to vector<64x128xf32>
    %52 = arith.addf %51, %50 : vector<64x128xf32>
    %53 = arith.mulf %15, %52 : vector<64x128xf32>
    %cst_23 = arith.constant dense<0.000000e+00> : vector<8x128xf32>
    %54 = tpu.matmul %1, %53, %cst_23 {dimension_numbers = #tpu.dot_dimension_numbers<[1], [0], [0], [1], [0, 0, 1, 1], [], []>} : vector<8x64xf32>, vector<64x128xf32>, vector<8x128xf32> -> vector<8x128xf32>
    %55 = arith.addf %54, %7 : vector<8x128xf32>
    %c0_24 = arith.constant 0 : index
    %56 = arith.index_cast %9 : i32 to index
    %57 = vector.load %arg7[%c0_24, %56] : memref<8x128xf32, #tpu.memory_space<vmem>>, vector<8x128xf32>
    tpu.vector_store %arg7[%c0_24, %56], %55 {strides = array<i32>} : memref<8x128xf32, #tpu.memory_space<vmem>>, vector<8x128xf32>,
    %c1_i32 = arith.constant 1 : i32
    return
  }
  func.func @transform_0(%arg0: i32, %arg1: i32) -> (i32, i32) {
    %c0_i32 = arith.constant 0 : i32
    return %arg0, %arg1 : i32, i32
  }
  func.func @transform_1(%arg0: i32, %arg1: i32) -> (i32, i32) {
    %c0_i32 = arith.constant 0 : i32
    %c0_i32_0 = arith.constant 0 : i32
    %c0_i32_1 = arith.constant 0 : i32
    return %c0_i32, %c0_i32_0 : i32, i32
  }
  func.func @transform_2(%arg0: i32, %arg1: i32) -> (i32, i32) {
    %c0_i32 = arith.constant 0 : i32
    %c0_i32_0 = arith.constant 0 : i32
    %c0_i32_1 = arith.constant 0 : i32
    return %c0_i32, %c0_i32_0 : i32, i32
  }
  func.func @transform_3(%arg0: i32, %arg1: i32) -> (i32, i32) {
    %c0_i32 = arith.constant 0 : i32
    %c0_i32_0 = arith.constant 0 : i32
    %c0_i32_1 = arith.constant 0 : i32
    return %c0_i32, %c0_i32_0 : i32, i32
  }
  func.func @transform_4(%arg0: i32, %arg1: i32) -> (i32, i32) {
    %c0_i32 = arith.constant 0 : i32
    %c0_i32_0 = arith.constant 0 : i32
    %c0_i32_1 = arith.constant 0 : i32
    return %c0_i32, %c0_i32_0 : i32, i32
  }
  func.func @transform_5(%arg0: i32, %arg1: i32) -> (i32, i32) {
    %c0_i32 = arith.constant 0 : i32
    return %arg0, %arg1 : i32, i32
  }
}

</mosaic_0001>

<bundles_post_ra>
// kernel: tpu_custom_call.1
= control target key start
LH: loop header
LB: loop body
LE: loop exit
PB: predicated region body
PF: predicated region fallthrough
CT: control target
= control target key end

     0   :  { %10 = vsyncpa [#allocation3], 0  ;;  %s1533_s0 = inlined_call_operand.vmem [shape: f32[8,256], index: 0, kind: input, shape index: {}]   ;;  %s1534_s1 = inlined_call_operand.vmem [shape: f32[64,8], index: 1, kind: input, shape index: {}]   ;;  %s1535_s2 = inlined_call_operand.vmem [shape: f32[64,1], index: 2, kind: input, shape index: {}]   ;;  %s1536_s3 = inlined_call_operand.vmem [shape: f32[8,64], index: 3, kind: input, shape index: {}]   ;;  %s1537_s4 = inlined_call_operand.vmem [shape: f32[8,1], index: 4, kind: input, shape index: {}]   ;;  %s1538_s5 = inlined_call_operand.hbm [shape: f32[8,256], index: 5, kind: output, shape index: {}]  }
   0x1   :  { %12 = vsyncpa [#allocation3 + $0x1], 0  ;;  %s1040_s18 = smov 0   ;;  %s1042_s19 = smov 0  }
   0x2   :  { %s1044_s20 = smov 0   ;;  %s1046_s21 = smov 0  }
   0x3   :  { %s1048_s22 = smov 0   ;;  %s1050_s23 = smov 0  }
   0x4 LB: > { %s816_s24 = sadd.s32 4294967295, %s1007_s23   ;;  %s817_s25 = sadd.s32 4294967294, %s1007_s23   ;;  %s1007_s23 = sphi %s1050_s23, %s18_s23   ;;  %s1003_s22 = sphi %s1048_s22, %s1565_s22   ;;  %s999_s21 = sphi %s1046_s21, %s1564_s21   ;;  %s995_s20 = sphi %s1044_s20, %s1563_s20   ;;  %s991_s19 = sphi %s1042_s19, %s1562_s19   ;;  %s987_s18 = sphi %s1040_s18, %s1561_s18  }
   0x5   : > { %s27_s26 = sadd.s32 1, %s1003_s22  ;;  %s151_s27 = sadd.s32 1, %s995_s20 }
   0x6   : > { %p28_p0 = scmp.ge.s32.totalorder %s27_s26, 2  ;;  %p161_p1 = scmp.ne.s32.totalorder %s995_s20, %s991_s19 }
   0x7   : > { %p162_p2 = scmp.eq.s32.totalorder %s816_s24, 1  ;;  %p167_p3 = scmp.ne.s32.totalorder %s991_s19, %s987_s18 }
   0x8   : > { %s1567_s26 = smov (%p28_p0, %s27_s26), 0  ;;  %p168_p5 = scmp.eq.s32.totalorder %s817_s25, 1 }
   0x9   : > { %p1080_p4 = por %p162_p2, %p161_p1  ;;  %s147_s29 = ssub.s32 %s1003_s22, %s1567_s26 }
   0xa   : > { %p820_p6 = scmp.ge.s32.totalorder %s1007_s23, 1  ;;  %p149_p7 = scmp.eq.s32.totalorder %s147_s29, 0 }
   0xb   : > { %p1087_p8 = por %p168_p5, %p167_p3  ;;  %p209_p9 = scmp.lt.s32.totalorder %s1007_s23, 3 }
   0xc   : > { %s1093_s6 = scalar_select %p149_p7, %s995_s20, %s151_s27  }
   0xd   : > { %p210_p10 = pnand %p820_p6, %p209_p9 }
   0xe   : > { %p242_p11 = scmp.lt.s32.totalorder (!%p210_p10), %s999_s21, 1  ;;  %s237_s24 = sand.u32 (!%p210_p10), 1, %s991_s19  }
   0xf   : > { %213 = sbr.rel (%p210_p10) target bundleno = 386 (0x182), region = 40  ;;  %s821_s25 = sshll.u32 (!%p210_p10), %s237_s24, 3 }
  0x10   : > { %s833_s27 = sshll.u32 (!%p210_p10), %s999_s21, 3  ;;  %s239_s9 = scalar_lea.vmem (!%p210_p10), [#allocation2], %s821_s25 }
  0x11   : > { %s736_s8 = scalar_lea.hbm (!%p210_p10), %s1538_s5, %s833_s27  ;;  %s738_s10 = sshll.u32 (!%p210_p10), %s239_s9, 4  ;;  %s739_s10 = int_to_ptr.vmem [resolvable:$true] %s738_s10 }
  0x12   : > { %s949_s16 = scalar_lea.hbm (!%p210_p10), %s1538_s5, 16 }
  0x14   : > { %v262_v0 = vld [vmem:[%s1535_s2 + $0x28] sm:$0xff]  ;;  %v1009_v1 = vmov 0   ;;  %v264_v2 = vld [vmem:[%s1535_s2 + $0x38] sm:$0xff]  ;;  %s243_s11 = scalar_select %p242_p11, %s999_s21, 1  ;;  %v248_v4 = vld [vmem:[%s1534_s1] sm:$0xff]  ;;  %vm312_vm0 = vcmask 64512  }
  0x15   : > { %895 = vset.pattern.permute.xlu1 %v1009_v1  ;;  %894 = vset.pattern.permute.xlu0 %v1009_v1  ;;  %v260_v3 = vld [vmem:[%s1535_s2 + $0x18] sm:$0xff]  ;;  %v254_v7 = vld [vmem:[%s1534_s1 + $0x30] sm:$0xff]  ;;  %v261_v8 = vld [vmem:[%s1535_s2 + $0x20] sm:$0xff] }
  0x16   : > { %292 = vperm.xlu1 %895, %v262_v0   ;;  %302 = vperm.xlu0 %894, %v264_v2   ;;  %s822_s12 = sshll.u32 %s243_s11, 3  ;;  %v251_v6 = vld [vmem:[%s1534_s1 + $0x18] sm:$0xff]  ;;  %v263_v9 = vld [vmem:[%s1535_s2 + $0x30] sm:$0xff]  ;;  %v249_v11 = vld [vmem:[%s1534_s1 + $0x8] sm:$0xff]  ;;  %s740_s11 = sshll.u32 %s736_s8, 4  ;;  %s741_s11 = int_to_ptr.hbm [resolvable:$true] %s740_s11 }
  0x17   : > { %896 = vset.pattern.permute.xlu2 %v1009_v1  ;;  %s247_s17 = scalar_lea.vmem %s1533_s0, %s822_s12  ;;  %v259_v10 = vld [vmem:[%s1535_s2 + $0x10] sm:$0xff]  ;;  %v252_v12 = vld [vmem:[%s1534_s1 + $0x20] sm:$0xff]  ;;  %v255_v13 = vld [vmem:[%s1534_s1 + $0x38] sm:$0xff]  ;;  %s724_s12 = scalar_lea.sflag [#allocation3], %s237_s24 }
  0x18   : > { %282 = vperm.xlu2 %896, %v260_v3   ;;  %v311_v5 = vld [vmem:[%s247_s17] sm:$0xff]  ;;  %v258_v15 = vld [vmem:[%s1535_s2 + $0x8] sm:$0xff]  ;;  %v250_v17 = vld [vmem:[%s1534_s1 + $0x10] sm:$0xff]  ;;  %s943_s13 = sshra.s32 %s741_s11, 4  ;;  %s944_s13 = int_to_ptr.hbm [resolvable:$true] %s943_s13 }
  0x19   : > { %352 = vmatpush.msra.mxu0 %v311_v5  ;;  %836 = vmatpush.msra.mxu2 %v311_v5  ;;  %v257_v14 = vld [vmem:[%s1535_s2] sm:$0xff]  ;;  %v253_v18 = vld [vmem:[%s1534_s1 + $0x28] sm:$0xff]  ;;  %s945_s14 = scalar_lea.hbm %s944_s13, 8  ;;  %p950_p1 = scmp.lt.s32.totalorder %s944_s13, %s1538_s5 }
  0x1a   : > { %837 = vmatpush.msra.mxu3 %v311_v5  ;;  %823 = vmatmul.msk.f32.vlgmr.msra.gmra.mxu0 %vm312_vm0, %v248_v4  ;;  %v305_v16 = vld [vmem:[%s1537_s4] sm:$0xff]  ;;  %p946_p12 = scmp.ne.s32.totalorder %s944_s13, %s945_s14  ;;  %p951_p2 = scmp.lt.s32.totalorder %s949_s16, %s945_s14 }
  0x1b   : > { %826 = vmatmul.msk.f32.vlgmr.msra.gmra.mxu2 %vm312_vm0, %v251_v6  ;;  %829 = vmatmul.msk.f32.vlgmr.msra.gmra.mxu3 %vm312_vm0, %v254_v7 }
  0x1c   : > { %p947_p13 = pnand %p946_p12, %p1080_p4  ;;  %p952_p3 = por %p951_p2, %p950_p1 }
  0x1e   : > { %287 = vperm.xlu1 %895, %v261_v8   ;;  %297 = vperm.xlu0 %894, %v263_v9   ;;  %p948_p0 = pneg %p947_p13 }
  0x20   : > { %277 = vperm.xlu2 %896, %v259_v10   ;;  %p953_p5 = pnand %p952_p3, %p948_p0 }
  0x22   : > { %824 = vmatmul.msk.f32.gmra.mxu0 %vm312_vm0, %v249_v11 }
  0x23   : > { %827 = vmatmul.msk.f32.gmra.mxu2 %vm312_vm0, %v252_v12  ;;  %830 = vmatmul.msk.f32.gmra.mxu3 %vm312_vm0, %v255_v13 }
  0x26   : > { %267 = vperm.xlu1 %895, %v257_v14   ;;  %272 = vperm.xlu0 %894, %v258_v15  }
  0x28   : > { %308 = vperm.xlu2 %896, %v305_v16  }
  0x2a   : > { %825 = vmatmul.msk.f32.gmra.mxu0 %vm312_vm0, %v250_v17 }
  0x2b   : > { %828 = vmatmul.msk.f32.gmra.mxu2 %vm312_vm0, %v253_v18 }
  0x72   : > { %v283_v28 = vpop.permute.xlu2 %282 }
  0x7a   : > { %v278_v62 = vpop.permute.xlu2 %277 }
  0x88   : > { %v1159_v19 = vpop.permute.xlu1 %292  ;;  %v303_v20 = vpop.permute.xlu0 %302 }
  0x90   : > { %v288_v21 = vpop.permute.xlu1 %287  ;;  %v298_v22 = vpop.permute.xlu0 %297 }
  0x97   : > { %v354_v24 = vpop.f32.mrf.mxu0 }
  0x98   : > { %v268_v23 = vpop.permute.xlu1 %267  ;;  %v273_v29 = vpop.permute.xlu0 %272 }
  0x99   : > { %v1161_v25 = vadd.f32 %v354_v24, %v268_v23 }
  0x9b   : > { %v1164_v26 = vmul.f32 0.70710677, %v1161_v25 }
  0x9d   : > { %v1167_v27 = vand.u32 2147483647, %v1164_v26 }
  0x9e   : > { %v363_v31 = vpop.f32.mrf.mxu2  ;;  %v372_v32 = vpop.f32.mrf.mxu3 }
  0x9f   : > { %v402_v30 = vmul.f32 0.3275911, %v1167_v27  ;;  %v1170_v33 = vadd.f32 %v363_v31, %v283_v28  ;;  %v1172_v34 = vadd.f32 %v372_v32, %v298_v22  ;;  %v357_v35 = vpop.f32.mrf.mxu0 }
  0xa0   : > { %v1176_v37 = vadd.f32 %v357_v35, %v273_v29 }
  0xa1   : > { %v1174_v36 = vadd.f32 1.0, %v402_v30  ;;  %v1179_v38 = vmul.f32 0.70710677, %v1170_v33  ;;  %v1182_v39 = vmul.f32 0.70710677, %v1172_v34 }
  0xa2   : > { %v1188_v42 = vmul.f32 0.70710677, %v1176_v37 }
  0xa3   : > { %897 = vrcp.f32 %v1174_v36  ;;  %v397_v40 = vand.u32 2147483647, %v1179_v38  ;;  %v400_v41 = vand.u32 2147483647, %v1182_v39 }
  0xa4   : > { %v395_v47 = vand.u32 2147483647, %v1188_v42 }
  0xa5   : > { %v405_v43 = vmul.f32 0.3275911, %v397_v40  ;;  %v613_v44 = vsub.f32 0.0, %v397_v40  ;;  %v408_v45 = vmul.f32 0.3275911, %v400_v41  ;;  %v616_v46 = vsub.f32 0.0, %v400_v41 }
  0xa6   : > { %v366_v48 = vpop.f32.mrf.mxu2  ;;  %v375_v49 = vpop.f32.mrf.mxu3  ;;  %v403_v54 = vmul.f32 0.3275911, %v395_v47  ;;  %v611_v1 = vsub.f32 0.0, %v395_v47 }
  0xa7   : > { %v1191_v50 = vadd.f32 1.0, %v405_v43  ;;  %v621_v51 = vmul.f32 %v613_v44, %v397_v40  ;;  %v1193_v52 = vadd.f32 1.0, %v408_v45  ;;  %v1197_v55 = vadd.f32 %v366_v48, %v288_v21  ;;  %v360_v59 = vpop.f32.mrf.mxu0 }
  0xa8   : > { %v376_v56 = vadd.f32 %v375_v49, %v303_v20  ;;  %v624_v57 = vmul.f32 %v616_v46, %v400_v41  ;;  %v1201_v58 = vadd.f32 1.0, %v403_v54  ;;  %v1211_v2 = vadd.f32 %v360_v59, %v278_v62 }
  0xa9   : > { %v1195_v53 = vpop.eup %897  ;;  %899 = vrcp.f32 %v1191_v50  ;;  %v632_v61 = vmul.f32 1.442695, %v621_v51  ;;  %v1206_v63 = vmul.f32 0.70710677, %v1197_v55  ;;  %v619_v16 = vmul.f32 %v611_v1, %v395_v47 }
  0xaa   : > { %901 = vrcp.f32 %v1193_v52  ;;  %v419_v60 = vmul.f32 %v1195_v53, %v1174_v36  ;;  %v1208_v0 = vmul.f32 0.70710677, %v376_v56  ;;  %v638_v3 = vmul.f32 1.442695, %v624_v57 }
  0xab   : > { %903 = vrcp.f32 %v1201_v58  ;;  %v398_v4 = vand.u32 2147483647, %v1206_v63  ;;  %v1218_v8 = vmul.f32 0.70710677, %v1211_v2  ;;  %vm513_vm1 = vweird.f32 %v1193_v52 }
  0xac   : > { %v401_v5 = vand.u32 2147483647, %v1208_v0  ;;  %v420_v7 = vsub.f32 1.0, %v419_v60  ;;  %905 = vpow2.f32 %v632_v61  ;;  %v1249_v47 = vmul.f32 1.442695, %v619_v16 }
  0xad   : > { %v406_v11 = vmul.f32 0.3275911, %v398_v4  ;;  %v614_v12 = vsub.f32 0.0, %v398_v4  ;;  %v396_v18 = vand.u32 2147483647, %v1218_v8  ;;  %907 = vpow2.f32 %v638_v3 }
  0xae   : > { %v409_v13 = vmul.f32 0.3275911, %v401_v5  ;;  %v369_v14 = vpop.f32.mrf.mxu2  ;;  %v617_v17 = vsub.f32 0.0, %v401_v5  ;;  %v1259_v57 = vmul.f32 0.5, %v376_v56  ;;  %vm468_vm6 = vweird.f32 %v1191_v50 }
  0xaf   : > { %v1215_v6 = vpop.eup %899  ;;  %v1227_v20 = vadd.f32 1.0, %v406_v11  ;;  %v622_v21 = vmul.f32 %v614_v12, %v398_v4  ;;  %v404_v28 = vmul.f32 0.3275911, %v396_v18  ;;  %v612_v29 = vsub.f32 0.0, %v396_v18 }
  0xb0   : > { %v1220_v9 = vpop.eup %901  ;;  %v464_v10 = vmul.f32 %v1215_v6, %v1191_v50  ;;  %v1229_v22 = vadd.f32 1.0, %v409_v13  ;;  %v1234_v30 = vadd.f32 %v369_v14, %v1159_v19  ;;  %v625_v35 = vmul.f32 %v617_v17, %v401_v5 }
  0xb1   : > { %v509_v15 = vmul.f32 %v1220_v9, %v1193_v52  ;;  %v1231_v23 = vpop.eup %903  ;;  %909 = vrcp.f32 %v1227_v20  ;;  %v634_v43 = vmul.f32 1.442695, %v622_v21  ;;  %v1243_v44 = vadd.f32 1.0, %v404_v28 }
  0xb2   : > { %v465_v31 = vsub.f32 1.0, %v464_v10  ;;  %v434_v32 = vmul.f32 %v1231_v23, %v1201_v58  ;;  %v1239_v40 = vpop.eup %905  ;;  %911 = vrcp.f32 %v1229_v22  ;;  %v620_v45 = vmul.f32 %v612_v29, %v396_v18 }
  0xb3   : > { %v510_v24 = vsub.f32 1.0, %v509_v15  ;;  %v1246_v19 = vmul.f32 %v1195_v53, %v420_v7  ;;  %v1252_v48 = vmul.f32 0.70710677, %v1234_v30  ;;  %v1254_v49 = vpop.eup %907  ;;  %v640_v54 = vmul.f32 1.442695, %v625_v35 }
  0xb4   : > { %v435_v41 = vsub.f32 1.0, %v434_v32  ;;  %v1257_v51 = vmul.f32 %v1215_v6, %v465_v31  ;;  %v532_v59 = vand.u32 2147483647, %v1229_v22  ;;  %vm483_vm2 = vweird.f32 %v1227_v20 }
  0xb5   : > { %v511_v46 = vmul.f32 %v1220_v9, %v510_v24  ;;  %913 = vrcp.f32 %v1243_v44  ;;  %v630_v60 = vmul.f32 1.442695, %v620_v45  ;;  %v399_v61 = vand.u32 2147483647, %v1252_v48 }
  0xb6   : > { %v1268_v1 = vmul.f32 %v1231_v23, %v435_v41  ;;  %915 = vpow2.f32 %v634_v43  ;;  %vm528_vm3 = vweird.f32 %v1229_v22  ;;  %v534_v56 = vand.u32 2147483648, %v1229_v22 }
  0xb7   : > { %v1265_v62 = vpop.eup %909  ;;  %v407_v5 = vmul.f32 0.3275911, %v399_v61  ;;  %v512_v7 = vadd.f32 %v1220_v9, %v511_v46  ;;  %vm514_vm4 = vweird.f32 %v1220_v9  ;;  %917 = vpow2.f32 %v640_v54 }
  0xb8   : > { %v912_v3 = vpop.eup %911  ;;  %v479_v4 = vmul.f32 %v1265_v62, %v1227_v20  ;;  %v615_v11 = vsub.f32 0.0, %v399_v61  ;;  %vm1277_vm5 = vcmp.eq.f32.partialorder %v532_v59, 8.507059e+37  ;;  %919 = vpow2.f32 %v630_v60  ;;  %vm1287_vm8 = vmor %vm513_vm1, %vm514_vm4 }
  0xb9   : > { %v524_v10 = vmul.f32 %v912_v3, %v1229_v22  ;;  %v1282_v14 = vadd.f32 1.0, %v407_v5  ;;  %v517_v15 = vand.u32 2147483647, %v1193_v52  ;;  %vm529_vm7 = vweird.f32 %v912_v3 }
  0xba   : > { %v480_v13 = vsub.f32 1.0, %v479_v4  ;;  %v535_v17 = vor.u32 1.1754944e-38, %v534_v56  ;;  %v519_v21 = vand.u32 2147483648, %v1193_v52  ;;  %v516_v29 = vsel %vm1287_vm8, %v1220_v9, %v512_v7  ;;  %vm530_vm13 = vmor %vm528_vm3, %vm529_vm7 }
  0xbb   : > { %v525_v16 = vsub.f32 1.0, %v524_v10  ;;  %v1292_v24 = vpop.eup %913  ;;  %921 = vrcp.f32 %v1282_v14  ;;  %vm484_vm9 = vweird.f32 %v1265_v62  ;;  %v1304_v35 = vmul.f32 %v615_v11, %v399_v61 }
  0xbc   : > { %v481_v28 = vmul.f32 %v1265_v62, %v480_v13  ;;  %v1300_v31 = vpop.eup %915  ;;  %v449_v32 = vmul.f32 %v1292_v24, %v1243_v44  ;;  %v520_v41 = vor.u32 1.1754944e-38, %v519_v21  ;;  %vm453_vm10 = vweird.f32 %v1243_v44  ;;  %vm1319_vm12 = vmor %vm483_vm2, %vm484_vm9 }
  0xbd   : > { %v526_v52 = vmul.f32 %v912_v3, %v525_v16  ;;  %vm518_vm11 = vcmp.eq.f32.partialorder %v517_v15, 8.507059e+37  ;;  %v504_v43 = vand.u32 2147483648, %v1282_v14  ;;  %v487_v9 = vand.u32 2147483647, %v1227_v20  ;;  %v1310_v46 = vpop.eup %917 }
  0xbe   : > { %v482_v45 = vadd.f32 %v1265_v62, %v481_v28  ;;  %v450_v54 = vsub.f32 1.0, %v449_v32  ;;  %v1312_v60 = vsel %vm518_vm11, %v520_v41, %v516_v29  ;;  %v502_v61 = vand.u32 2147483647, %v1282_v14  ;;  %v1323_v4 = vpop.eup %919 }
  0xbf   : > { %v527_v59 = vadd.f32 %v912_v3, %v526_v52  ;;  %v544_v5 = vmul.f32 1.0614054, %v1312_v60  ;;  %v505_v7 = vor.u32 1.1754944e-38, %v504_v43  ;;  %vm1332_vm14 = vcmp.eq.f32.partialorder %v487_v9, 8.507059e+37 }
  0xc0   : > { %v486_v10 = vsel %vm1319_vm12, %v1265_v62, %v482_v45  ;;  %v451_v13 = vmul.f32 %v1292_v24, %v450_v54  ;;  %vm498_vm15 = vweird.f32 %v1282_v14  ;;  %v489_v16 = vand.u32 2147483648, %v1227_v20 }
  0xc1   : > { %v531_v15 = vsel %vm530_vm13, %v912_v3, %v527_v59  ;;  %v467_v22 = vadd.f32 %v1215_v6, %v1257_v51  ;;  %v922_v18 = vpop.eup %921  ;;  %v552_v62 = vadd.f32 -1.4531521, %v544_v5  ;;  %vm469_vm0 = vweird.f32 %v1215_v6 }
  0xc2   : > { %v1343_v21 = vsel %vm1277_vm5, %v535_v17, %v531_v15  ;;  %v472_v28 = vand.u32 2147483647, %v1191_v50  ;;  %v494_v29 = vmul.f32 %v922_v18, %v1282_v14  ;;  %vm499_vm1 = vweird.f32 %v922_v18  ;;  %vm1355_vm3 = vmor %vm468_vm6, %vm469_vm0 }
  0xc3   : > { %v545_v32 = vmul.f32 1.0614054, %v1343_v21  ;;  %vm1349_vm2 = vcmp.eq.f32.partialorder %v502_v61, 8.507059e+37  ;;  %v490_v51 = vor.u32 1.1754944e-38, %v489_v16  ;;  %v560_v12 = vmul.f32 %v552_v62, %v1312_v60  ;;  %vm500_vm9 = vmor %vm498_vm15, %vm499_vm1 }
  0xc4   : > { %v471_v17 = vsel %vm1355_vm3, %v1215_v6, %v467_v22  ;;  %vm1363_vm4 = vcmp.eq.f32.partialorder %v472_v28, 8.507059e+37  ;;  %v474_v41 = vand.u32 2147483648, %v1191_v50  ;;  %v495_v43 = vsub.f32 1.0, %v494_v29 }
  0xc5   : > { %v553_v45 = vadd.f32 -1.4531521, %v545_v32  ;;  %v1370_v9 = vsel %vm1332_vm14, %v490_v51, %v486_v10  ;;  %v452_v54 = vadd.f32 %v1292_v24, %v451_v13  ;;  %vm438_vm5 = vweird.f32 %v1201_v58 }
  0xc6   : > { %v568_v59 = vadd.f32 1.4214138, %v560_v12  ;;  %v542_v61 = vmul.f32 1.0614054, %v1370_v9  ;;  %v475_v6 = vor.u32 1.1754944e-38, %v474_v41  ;;  %vm454_vm6 = vweird.f32 %v1292_v24 }
  0xc7   : > { %v496_v56 = vmul.f32 %v922_v18, %v495_v43  ;;  %v561_v5 = vmul.f32 %v553_v45, %v1343_v21  ;;  %vm1379_vm7 = vmor %vm453_vm10, %vm454_vm6  ;;  %v457_v10 = vand.u32 2147483647, %v1243_v44  ;;  %v459_v11 = vand.u32 2147483648, %v1243_v44 }
  0xc8   : > { %v576_v13 = vmul.f32 %v568_v59, %v1312_v60  ;;  %v550_v15 = vadd.f32 -1.4531521, %v542_v61  ;;  %v1388_v16 = vsel %vm1363_vm4, %v475_v6, %v471_v17  ;;  %v456_v22 = vsel %vm1379_vm7, %v1292_v24, %v452_v54 }
  0xc9   : > { %v569_v62 = vadd.f32 1.4214138, %v561_v5  ;;  %v497_v28 = vadd.f32 %v922_v18, %v496_v56  ;;  %v541_v29 = vmul.f32 1.0614054, %v1388_v16  ;;  %vm458_vm8 = vcmp.eq.f32.partialorder %v457_v10, 8.507059e+37 }
  0xca   : > { %v584_v32 = vadd.f32 -0.28449672, %v576_v13  ;;  %v558_v44 = vmul.f32 %v550_v15, %v1370_v9  ;;  %v460_v51 = vor.u32 1.1754944e-38, %v459_v11  ;;  %v437_v3 = vadd.f32 %v1231_v23, %v1268_v1 }
  0xcb   : > { %v577_v12 = vmul.f32 %v569_v62, %v1343_v21  ;;  %v501_v17 = vsel %vm500_vm9, %v922_v18, %v497_v28  ;;  %v549_v24 = vadd.f32 -1.4531521, %v541_v29  ;;  %vm439_vm10 = vweird.f32 %v1231_v23 }
  0xcc   : > { %vm423_vm11 = vweird.f32 %v1174_v36  ;;  %v592_v52 = vmul.f32 %v584_v32, %v1312_v60  ;;  %v1406_v14 = vsel %vm1349_vm2, %v505_v7, %v501_v17  ;;  %v566_v41 = vadd.f32 1.4214138, %v558_v44  ;;  %vm1421_vm12 = vmor %vm438_vm5, %vm439_vm10 }
  0xcd   : > { %v1408_v43 = vsel %vm458_vm8, %v460_v51, %v456_v22  ;;  %v585_v45 = vadd.f32 -0.28449672, %v577_v12  ;;  %v543_v1 = vmul.f32 1.0614054, %v1406_v14  ;;  %v557_v54 = vmul.f32 %v549_v24, %v1388_v16 }
  0xce   : > { %v540_v18 = vmul.f32 1.0614054, %v1408_v43  ;;  %v636_v59 = vmul.f32 1.442695, %v1304_v35  ;;  %v600_v61 = vadd.f32 0.2548296, %v592_v52  ;;  %v574_v6 = vmul.f32 %v566_v41, %v1370_v9 }
  0xcf   : > { %v442_v56 = vand.u32 2147483647, %v1201_v58  ;;  %v593_v7 = vmul.f32 %v585_v45, %v1343_v21  ;;  %v551_v20 = vadd.f32 -1.4531521, %v543_v1  ;;  %v565_v5 = vadd.f32 1.4214138, %v557_v54 }
  0xd0   : > { %v548_v50 = vadd.f32 -1.4531521, %v540_v18  ;;  %vm664_vm13 = vcmp.lt.f32.partialorder %v1182_v39, 0.0  ;;  %v608_v35 = vmul.f32 %v600_v61, %v1312_v60  ;;  %v582_v11 = vadd.f32 -0.28449672, %v574_v6 }
  0xd1   : > { %v441_v13 = vsel %vm1421_vm12, %v1231_v23, %v437_v3  ;;  %v444_v15 = vand.u32 2147483648, %v1201_v58  ;;  %v601_v22 = vadd.f32 0.2548296, %v593_v7  ;;  %v559_v62 = vmul.f32 %v551_v20, %v1406_v14 }
  0xd2   : > { %v573_v28 = vmul.f32 %v565_v5, %v1388_v16  ;;  %v556_v29 = vmul.f32 %v548_v50, %v1408_v43  ;;  %vm665_vm14 = vcmp.lt.f32.partialorder %v1208_v0, 0.0  ;;  %v648_v32 = vmul.f32 %v1254_v49, %v608_v35 }
  0xd3   : > { %v590_v60 = vmul.f32 %v582_v11, %v1370_v9  ;;  %vm443_vm15 = vcmp.eq.f32.partialorder %v442_v56, 8.507059e+37  ;;  %v445_v44 = vor.u32 1.1754944e-38, %v444_v15  ;;  %v609_v51 = vmul.f32 %v601_v22, %v1343_v21 }
  0xd4   : > { %v567_v23 = vadd.f32 1.4214138, %v559_v62  ;;  %v581_v3 = vadd.f32 -0.28449672, %v573_v28  ;;  %v564_v58 = vadd.f32 1.4214138, %v556_v29  ;;  %vm424_vm0 = vweird.f32 %v1195_v53 }
  0xd5   : > { %v656_v12 = vsub.f32 1.0, %v648_v32  ;;  %v598_v17 = vadd.f32 0.2548296, %v590_v60  ;;  %v1438_v24 = vsel %vm443_vm15, %v445_v44, %v441_v13  ;;  %v649_v52 = vmul.f32 %v1310_v46, %v609_v51  ;;  %vm1451_vm1 = vmor %vm423_vm11, %vm424_vm0 }
  0xd6   : > { %v575_v41 = vmul.f32 %v567_v23, %v1406_v14  ;;  %v589_v49 = vmul.f32 %v581_v3, %v1388_v16  ;;  %v572_v45 = vmul.f32 %v564_v58, %v1408_v43  ;;  %v539_v54 = vmul.f32 1.0614054, %v1438_v24 }
  0xd7   : > { %v672_v1 = vsub.f32 0.0, %v656_v12  ;;  %v606_v21 = vmul.f32 %v598_v17, %v1370_v9  ;;  %v422_v18 = vadd.f32 %v1195_v53, %v1246_v19  ;;  %923 = vpow2.f32 %v636_v59 }
  0xd8   : > { %v657_v61 = vsub.f32 1.0, %v649_v52  ;;  %v583_v6 = vadd.f32 -0.28449672, %v575_v41  ;;  %v597_v56 = vadd.f32 0.2548296, %v589_v49  ;;  %v429_v9 = vand.u32 2147483648, %v1174_v36 }
  0xd9   : > { %v646_v7 = vmul.f32 %v1300_v31, %v606_v21  ;;  %v580_v20 = vadd.f32 -0.28449672, %v572_v45  ;;  %v547_v5 = vadd.f32 -1.4531521, %v539_v54  ;;  %v680_v19 = vsel %vm664_vm13, %v672_v1, %v656_v12 }
  0xda   : > { %v673_v50 = vsub.f32 0.0, %v657_v61  ;;  %v591_v59 = vmul.f32 %v583_v6, %v1406_v14  ;;  %v605_v10 = vmul.f32 %v597_v56, %v1388_v16  ;;  %v426_v31 = vsel %vm1451_vm1, %v1195_v53, %v422_v18 }
  0xdb   : > { %v588_v35 = vmul.f32 %v580_v20, %v1408_v43  ;;  %v555_v11 = vmul.f32 %v547_v5, %v1438_v24  ;;  %v427_v13 = vand.u32 2147483647, %v1174_v36  ;;  %v654_v39 = vsub.f32 1.0, %v646_v7 }
  0xdc   : > { %v681_v15 = vsel %vm665_vm14, %v673_v50, %v657_v61  ;;  %v599_v22 = vadd.f32 0.2548296, %v591_v59  ;;  %v645_v62 = vmul.f32 %v1239_v40, %v605_v10  ;;  %v688_v29 = vadd.f32 1.0, %v680_v19 }
  0xdd   : > { %v689_v28 = vadd.f32 1.0, %v681_v15  ;;  %v596_v16 = vadd.f32 0.2548296, %v588_v35  ;;  %v563_v32 = vadd.f32 1.4214138, %v555_v11  ;;  %v924_v60 = vpop.eup %923  ;;  %vm428_vm2 = vcmp.eq.f32.partialorder %v427_v13, 8.507059e+37 }
  0xde   : > { %v607_v44 = vmul.f32 %v599_v22, %v1406_v14  ;;  %v653_v51 = vsub.f32 1.0, %v645_v62  ;;  %v430_v23 = vor.u32 1.1754944e-38, %v429_v9  ;;  %v384_v53 = vmul.f32 0.5, %v1172_v34 }
  0xdf   : > { %v697_v36 = vmul.f32 %v689_v28, %v1259_v57  ;;  %v604_v0 = vmul.f32 %v596_v16, %v1408_v43  ;;  %v571_v3 = vmul.f32 %v563_v32, %v1438_v24  ;;  %v610_v40 = vsub.f32 0.0, %v1167_v27 }
  0xe0   : > { %v647_v58 = vmul.f32 %v924_v60, %v607_v44  ;;  %v670_v12 = vsub.f32 0.0, %v654_v39  ;;  %v431_v17 = vsel %vm428_vm2, %v430_v23, %v426_v31  ;;  %v696_v52 = vmul.f32 %v688_v29, %v384_v53 }
  0xe1   : > { %710 = vmatpush.msra.mxu1 %v697_v36  ;;  %v644_v14 = vmul.f32 %v1323_v4, %v604_v0  ;;  %v579_v41 = vadd.f32 -0.28449672, %v571_v3  ;;  %v538_v49 = vmul.f32 1.0614054, %v431_v17  ;;  %925 = vpow2.f32 %v1249_v47 }
  0xe2   : > { %v655_v34 = vsub.f32 1.0, %v647_v58  ;;  %v669_v45 = vsub.f32 0.0, %v653_v51  ;;  %vm662_vm3 = vcmp.lt.f32.partialorder %v1206_v63, 0.0  ;;  %v618_v21 = vmul.f32 %v610_v40, %v1167_v27 }
  0xe3   : > { %711 = vmatpush.msra.mxu1 %v696_v52  ;;  %v652_v57 = vsub.f32 1.0, %v644_v14  ;;  %v587_v43 = vmul.f32 %v579_v41, %v1438_v24  ;;  %v546_v1 = vadd.f32 -1.4531521, %v538_v49  ;;  %vm661_vm4 = vcmp.lt.f32.partialorder %v1179_v38, 0.0 }
  0xe4   : > { %v671_v54 = vsub.f32 0.0, %v655_v34  ;;  %v678_v18 = vsel %vm662_vm3, %v670_v12, %v654_v39  ;;  %vm663_vm5 = vcmp.lt.f32.partialorder %v1252_v48, 0.0  ;;  %vm660_vm6 = vcmp.lt.f32.partialorder %v1218_v8, 0.0 }
  0xe5   : > { %v668_v4 = vsub.f32 0.0, %v652_v57  ;;  %v595_v61 = vadd.f32 0.2548296, %v587_v43  ;;  %v554_v47 = vmul.f32 %v546_v1, %v431_v17  ;;  %v383_v63 = vmul.f32 0.5, %v1234_v30 }
  0xe6   : > { %v679_v6 = vsel %vm663_vm5, %v671_v54, %v655_v34  ;;  %v677_v56 = vsel %vm661_vm4, %v669_v45, %v653_v51  ;;  %v686_v7 = vadd.f32 1.0, %v678_v18  ;;  %v626_v38 = vmul.f32 1.442695, %v618_v21 }
  0xe7   : > { %v687_v46 = vadd.f32 1.0, %v679_v6  ;;  %v603_v20 = vmul.f32 %v595_v61, %v1438_v24  ;;  %v562_v27 = vadd.f32 1.4214138, %v554_v47  ;;  %v926_v5 = vpop.eup %925  ;;  %v382_v9 = vmul.f32 0.5, %v1197_v55 }
  0xe8   : > { %v676_v50 = vsel %vm660_vm6, %v668_v4, %v652_v57  ;;  %v685_v19 = vadd.f32 1.0, %v677_v56  ;;  %v381_v8 = vmul.f32 0.5, %v1170_v33  ;;  %927 = vpow2.f32 %v626_v38 }
  0xe9   : > { %v695_v48 = vmul.f32 %v687_v46, %v383_v63  ;;  %v643_v59 = vmul.f32 %v926_v5, %v603_v20  ;;  %v570_v10 = vmul.f32 %v562_v27, %v431_v17  ;;  %v694_v30 = vmul.f32 %v686_v7, %v382_v9 }
  0xea   : > { %v684_v35 = vadd.f32 1.0, %v676_v50  ;;  %v380_v24 = vmul.f32 0.5, %v1211_v2  ;;  %v693_v13 = vmul.f32 %v685_v19, %v381_v8  ;;  %vm659_vm7 = vcmp.lt.f32.partialorder %v1188_v42, 0.0 }
  0xeb   : > { %712 = vmatpush.msra.mxu1 %v695_v48  ;;  %v651_v11 = vsub.f32 1.0, %v643_v59  ;;  %v578_v31 = vadd.f32 -0.28449672, %v570_v10  ;;  %v379_v33 = vmul.f32 0.5, %v1176_v37  ;;  %vm658_vm8 = vcmp.lt.f32.partialorder %v1164_v26, 0.0  ;;  %v256_v37 = vld [vmem:[%s1536_s3] sm:$0xff] }
  0xec   : > { %v692_v55 = vmul.f32 %v684_v35, %v380_v24  ;;  %v378_v51 = vmul.f32 0.5, %v1161_v25  ;;  %vm698_vm9 = vcmask 523264   ;;  %v309_v25 = vpop.permute.xlu2 %308 }
  0xed   : > { %713 = vmatpush.msra.mxu1 %v694_v30  ;;  %v667_v15 = vsub.f32 0.0, %v651_v11  ;;  %v586_v22 = vmul.f32 %v578_v31, %v431_v17 }
  0xee   : > { %v928_v16 = vpop.eup %927 }
  0xef   : > { %714 = vmatpush.msra.mxu1 %v693_v13  ;;  %v675_v39 = vsel %vm659_vm7, %v667_v15, %v651_v11  ;;  %v594_v62 = vadd.f32 0.2548296, %v586_v22 }
  0xf0   : > { %v683_v28 = vadd.f32 1.0, %v675_v39 }
  0xf1   : > { %715 = vmatpush.msra.mxu1 %v692_v55  ;;  %v602_v29 = vmul.f32 %v594_v62, %v431_v17 }
  0xf2   : > { %v691_v32 = vmul.f32 %v683_v28, %v379_v33 }
  0xf3   : > { %v642_v2 = vmul.f32 %v928_v16, %v602_v29 }
  0xf4   : > { %716 = vmatpush.msra.mxu1 %v691_v32 }
  0xf5   : > { %v650_v60 = vsub.f32 1.0, %v642_v2 }
  0xf7   : > { %v666_v44 = vsub.f32 0.0, %v650_v60 }
  0xf9   : > { %v674_v42 = vsel %vm658_vm8, %v666_v44, %v650_v60 }
  0xfa   : > { %v682_v23 = vadd.f32 1.0, %v674_v42 }
  0xfc   : > { %v690_v53 = vmul.f32 %v682_v23, %v378_v51 }
  0xfe   : > { %717 = vmatpush.msra.mxu1 %v690_v53 }
  0xff   : > { %831 = vmatmul.msk.f32.vlgmr.msra.gmra.mxu1 %vm698_vm9, %v256_v37 }
 0x17c   : > { %v719_v26 = vpop.f32.mrf.mxu1 }
 0x17d   : > { %v720_v36 = vadd.f32 %v719_v26, %v309_v25 }
 0x17f   : > { %722 = vst [vmem:[%s239_s9] sm:$0xff] %v720_v36 }
 0x180   : > { %956 = shalt.err (!%p953_p5)
}
 0x181   : > { %838 = dma.vmem_to_hbm [thread:$0]  (%p1080_p4), %s739_s10, 128, %s741_s11, %s724_s12  }
 0x182 PF: > { %p844_p6 = scmp.ge.s32.totalorder %s1007_s23, 2  ;;  %s752_s24 = sand.u32 1, %s987_s18  }
 0x183   : > { %s753_s27 = scalar_lea.sflag [#allocation3], %s752_s24 }
 0x184   : > { %p841_p7 = pnand %p844_p6, %p1087_p8 }
 0x186   : > { %p842_p9 = pneg %p841_p7 }
 0x188   : > { %982 = dma.done.wait (%p842_p9), %s753_s27, 128  }
 0x189   : > { %984 = vsyncadd (%p842_p9), %s753_s27, 4294967168  ;;  %s18_s23 = sadd.s32 1, %s1007_s23   ;;  %s1561_s18 = smov %s991_s19 }
 0x18a   : > { %p15_p10 = scmp.ge.s32.totalorder %s18_s23, 4   ;;  %s1562_s19 = smov %s995_s20 }
 0x18b   : > { %s1563_s20 = smov %s1093_s6  ;;  %s1564_s21 = smov %s1003_s22 }
 0x18c   : > { %s1565_s22 = smov %s1567_s26  ;;  %17 = sbr.rel (!%p15_p10) target bundleno = 4 (0x4), region = 75 }
 0x191   :  { %759 = vsyncpa [#allocation3], 1 }
 0x192   :  { %761 = vsyncpa [#allocation3 + $0x1], 1 }

</bundles_post_ra>
